<compile_context>
chip_gen: v7x
topology: tpu7x:2x2x1
jax: 0.10.0
libtpu: 0.0.40
codegen_flags: <defaults>
</compile_context>

<pallas_src>
import jax
import jax.numpy as jnp
from jax.experimental import pallas as pl
from jax.experimental.pallas import tpu as pltpu

LANE = 128
SUBLANE = 8


def _round_up(x, m):
    return ((x + m - 1) // m) * m


def _policy_kernel(x_ref, w1_ref, b1_ref, w2_ref, b2_ref, w3_ref, b3_ref, out_ref):
    x = x_ref[...]                                                     # (TB, obs) bf16

    # l1 + ReLU  (bf16 MXU inputs, f32 accumulate / bias / relu)
    # padded hidden-1 lanes: w1 cols = 0, b1 = 0  ->  ReLU(0) = 0 exactly
    h1 = jnp.dot(x, w1_ref[...], preferred_element_type=jnp.float32) + b1_ref[...]
    h1 = jnp.maximum(h1, 0.0)

    # l2 + ReLU  (padded h1 lanes hit zero rows of w2, so result is unchanged)
    h2 = jnp.dot(h1.astype(jnp.bfloat16), w2_ref[...],
                 preferred_element_type=jnp.float32) + b2_ref[...]
    h2 = jnp.maximum(h2, 0.0)

    # l3 (lane-padded to 128 columns; padded cols carry bias -1e30)
    logits = jnp.dot(h2.astype(jnp.bfloat16), w3_ref[...],
                     preferred_element_type=jnp.float32) + b3_ref[...]

    # numerically stable softmax; padded columns underflow exp() to exactly 0
    m = jnp.max(logits, axis=-1, keepdims=True)
    e = jnp.exp(logits - m)
    denom = jnp.sum(e, axis=-1, keepdims=True)
    out_ref[...] = e * pl.reciprocal(denom, approx=False)


def cartpole_policy_forward(x, params, tb=512):
    """x: (B, obs_dim) float32. params: dict of w1,b1,w2,b2,w3,b3 (f32)."""
    B, obs_dim = x.shape
    h1_dim = params["w1"].shape[1]          # 64
    h2_dim = params["w2"].shape[1]          # 128
    n_actions = params["w3"].shape[1]

    # Batch tile: big (512) for large batches so the per-step ~600-cycle floor is
    # amortized; tiny batches only round up to the 8-row sublane boundary.
    tb = min(tb, _round_up(B, SUBLANE))
    b_pad = _round_up(B, tb)

    h1_pad = _round_up(h1_dim, LANE)        # 128  (lane-dense intermediate)
    n_pad = _round_up(n_actions, LANE)      # 128  (lane-dense output)

    # Pad batch rows with zeros (softmax of zero rows is harmless; sliced off below).
    if b_pad != B:
        x = jnp.zeros((b_pad, obs_dim), jnp.float32).at[:B].set(x)
    x_bf = x.astype(jnp.bfloat16)

    # bf16 weights for the MXU; f32 biases for the f32 epilogue.
    # l1: zero-pad output columns to 128 lanes (padded bias 0 -> ReLU 0).
    w1 = jnp.zeros((obs_dim, h1_pad), jnp.bfloat16)
    w1 = w1.at[:, :h1_dim].set(params["w1"].astype(jnp.bfloat16))
    b1 = jnp.zeros((1, h1_pad), jnp.float32)
    b1 = b1.at[:, :h1_dim].set(params["b1"].astype(jnp.float32).reshape(1, -1))

    # l2: zero-pad input rows to match the padded h1 lanes.
    w2 = jnp.zeros((h1_pad, h2_dim), jnp.bfloat16)
    w2 = w2.at[:h1_dim, :].set(params["w2"].astype(jnp.bfloat16))
    b2 = params["b2"].astype(jnp.float32).reshape(1, -1)

    # l3: zero-pad weight columns, padded bias -> -1e30 so softmax is exactly 0 there.
    w3 = jnp.zeros((h2_dim, n_pad), jnp.bfloat16)
    w3 = w3.at[:, :n_actions].set(params["w3"].astype(jnp.bfloat16))
    b3 = jnp.full((1, n_pad), -1e30, jnp.float32)
    b3 = b3.at[:, :n_actions].set(params["b3"].astype(jnp.float32).reshape(1, -1))

    grid = (b_pad // tb,)
    out_padded = pl.pallas_call(
        _policy_kernel,
        out_shape=jax.ShapeDtypeStruct((b_pad, n_pad), jnp.float32),
        grid=grid,
        in_specs=[
            pl.BlockSpec((tb, obs_dim), lambda i: (i, 0)),   # x: tiled over batch
            pl.BlockSpec(w1.shape, lambda i: (0, 0)),        # weights/biases: resident
            pl.BlockSpec(b1.shape, lambda i: (0, 0)),
            pl.BlockSpec(w2.shape, lambda i: (0, 0)),
            pl.BlockSpec(b2.shape, lambda i: (0, 0)),
            pl.BlockSpec(w3.shape, lambda i: (0, 0)),
            pl.BlockSpec(b3.shape, lambda i: (0, 0)),
        ],
        out_specs=pl.BlockSpec((tb, n_pad), lambda i: (i, 0)),
        compiler_params=pltpu.CompilerParams(
            dimension_semantics=("parallel",)),              # shard batch across v7x TCs
    )(x_bf, w1, b1, w2, b2, w3, b3)

    return out_padded[:B, :n_actions]


def init_params(key, obs_dim, n_actions):
    """Deterministic init mimicking PyTorch Linear default (U[-1/sqrt(in), 1/sqrt(in)])."""
    ks = jax.random.split(key, 6)

    def linear(kw, kb, fan_in, fan_out):
        bound = 1.0 / jnp.sqrt(float(fan_in))
        w = jax.random.uniform(kw, (fan_in, fan_out), jnp.float32, -bound, bound)
        b = jax.random.uniform(kb, (1, fan_out), jnp.float32, -bound, bound)
        return w, b

    w1, b1 = linear(ks[0], ks[1], obs_dim, 64)
    w2, b2 = linear(ks[2], ks[3], 64, 128)
    w3, b3 = linear(ks[4], ks[5], 128, n_actions)
    return {"w1": w1, "b1": b1, "w2": w2, "b2": b2, "w3": w3, "b3": b3}


def _reference_f32(x, p):
    h1 = jnp.maximum(x @ p["w1"] + p["b1"], 0.0)
    h2 = jnp.maximum(h1 @ p["w2"] + p["b2"], 0.0)
    logits = h2 @ p["w3"] + p["b3"]
    return jax.nn.softmax(logits, axis=-1)


def _reference_bf16(x, p):
    bf = jnp.bfloat16
    h1 = jnp.maximum(
        jnp.dot(x.astype(bf), p["w1"].astype(bf),
                preferred_element_type=jnp.float32) + p["b1"], 0.0)
    h2 = jnp.maximum(
        jnp.dot(h1.astype(bf), p["w2"].astype(bf),
                preferred_element_type=jnp.float32) + p["b2"], 0.0)
    logits = jnp.dot(h2.astype(bf), p["w3"].astype(bf),
                     preferred_element_type=jnp.float32) + p["b3"]
    return jax.nn.softmax(logits, axis=-1)


if __name__ == "__main__":
    obs_dim, n_actions, batch = 4, 2, 8   # CartPole-v1: obs_dim=4, n_actions=2
    key = jax.random.PRNGKey(0)
    k_x, k_p = jax.random.split(key)

    x = jax.random.normal(k_x, (batch, obs_dim), dtype=jnp.float32)
    params = init_params(k_p, obs_dim, n_actions)

    out = cartpole_policy_forward(x, params)
    out = jax.block_until_ready(out)

    assert out.shape == (batch, n_actions)
    # rows sum to 1 (softmax), padded lanes contribute exactly 0
    assert jnp.allclose(jnp.sum(out, axis=-1), 1.0, atol=1e-5)
    # bf16 MXU inputs: compare against f32 reference at bf16-appropriate tolerance
    ref32 = _reference_f32(x, params)
    assert jnp.allclose(out, ref32, atol=2e-2, rtol=2e-2)
    # tighter check against a matched bf16-input / f32-accumulate reference
    ref_bf = _reference_bf16(x, params)
    assert jnp.allclose(out, ref_bf, atol=1e-3, rtol=1e-3)

    print("KERNEL_OK")
</pallas_src>

<mosaic_0001>
module attributes {stable_mosaic.version = 11 : i64} {
  func.func @_policy_kernel(%arg0: i32, %arg1: memref<8x4xbf16, #tpu.memory_space<vmem>>, %arg2: memref<4x128xbf16, #tpu.memory_space<vmem>>, %arg3: memref<1x128xf32, #tpu.memory_space<vmem>>, %arg4: memref<128x128xbf16, #tpu.memory_space<vmem>>, %arg5: memref<1x128xf32, #tpu.memory_space<vmem>>, %arg6: memref<128x128xbf16, #tpu.memory_space<vmem>>, %arg7: memref<1x128xf32, #tpu.memory_space<vmem>>, %arg8: memref<8x128xf32, #tpu.memory_space<vmem>>) attributes {dimension_semantics = [#tpu.dimension_semantics<parallel>], iteration_bounds = array<i64: 1>, scalar_prefetch = 0 : i64, scratch_operands = 0 : i64, tpu.core_type = #tpu.core_type<tc>, window_params = [{transform_indices = @transform_0, window_bounds = array<i64: 8, 4>}, {pipeline_mode = #tpu.pipeline_mode<synchronous>, transform_indices = @transform_1, window_bounds = array<i64: 4, 128>}, {pipeline_mode = #tpu.pipeline_mode<synchronous>, transform_indices = @transform_2, window_bounds = array<i64: 1, 128>}, {pipeline_mode = #tpu.pipeline_mode<synchronous>, transform_indices = @transform_3, window_bounds = array<i64: 128, 128>}, {pipeline_mode = #tpu.pipeline_mode<synchronous>, transform_indices = @transform_4, window_bounds = array<i64: 1, 128>}, {pipeline_mode = #tpu.pipeline_mode<synchronous>, transform_indices = @transform_5, window_bounds = array<i64: 128, 128>}, {pipeline_mode = #tpu.pipeline_mode<synchronous>, transform_indices = @transform_6, window_bounds = array<i64: 1, 128>}, {transform_indices = @transform_7, window_bounds = array<i64: 8, 128>}]} {
    %c0 = arith.constant 0 : index
    %c0_0 = arith.constant 0 : index
    %0 = vector.load %arg1[%c0, %c0_0] : memref<8x4xbf16, #tpu.memory_space<vmem>>, vector<8x4xbf16>
    %c0_1 = arith.constant 0 : index
    %c0_2 = arith.constant 0 : index
    %1 = vector.load %arg2[%c0_1, %c0_2] : memref<4x128xbf16, #tpu.memory_space<vmem>>, vector<4x128xbf16>
    %cst = arith.constant dense<0.000000e+00> : vector<8x128xf32>
    %2 = tpu.matmul %0, %1, %cst {dimension_numbers = #tpu.dot_dimension_numbers<[1], [0], [0], [1], [0, 0, 1, 1], [], []>} : vector<8x4xbf16>, vector<4x128xbf16>, vector<8x128xf32> -> vector<8x128xf32>
    %c0_3 = arith.constant 0 : index
    %c0_4 = arith.constant 0 : index
    %3 = vector.load %arg3[%c0_3, %c0_4] : memref<1x128xf32, #tpu.memory_space<vmem>>, vector<1x128xf32>
    %4 = vector.broadcast %3 : vector<1x128xf32> to vector<8x128xf32>
    %5 = arith.addf %2, %4 : vector<8x128xf32>
    %cst_5 = arith.constant 0.000000e+00 : f32
    %6 = vector.broadcast %cst_5 : f32 to vector<8x128xf32>
    %7 = arith.maximumf %5, %6 : vector<8x128xf32>
    %8 = arith.truncf %7 : vector<8x128xf32> to vector<8x128xbf16>
    %c0_6 = arith.constant 0 : index
    %c0_7 = arith.constant 0 : index
    %9 = vector.load %arg4[%c0_6, %c0_7] : memref<128x128xbf16, #tpu.memory_space<vmem>>, vector<128x128xbf16>
    %cst_8 = arith.constant dense<0.000000e+00> : vector<8x128xf32>
    %10 = tpu.matmul %8, %9, %cst_8 {dimension_numbers = #tpu.dot_dimension_numbers<[1], [0], [0], [1], [0, 0, 1, 1], [], []>} : vector<8x128xbf16>, vector<128x128xbf16>, vector<8x128xf32> -> vector<8x128xf32>
    %c0_9 = arith.constant 0 : index
    %c0_10 = arith.constant 0 : index
    %11 = vector.load %arg5[%c0_9, %c0_10] : memref<1x128xf32, #tpu.memory_space<vmem>>, vector<1x128xf32>
    %12 = vector.broadcast %11 : vector<1x128xf32> to vector<8x128xf32>
    %13 = arith.addf %10, %12 : vector<8x128xf32>
    %cst_11 = arith.constant 0.000000e+00 : f32
    %14 = vector.broadcast %cst_11 : f32 to vector<8x128xf32>
    %15 = arith.maximumf %13, %14 : vector<8x128xf32>
    %16 = arith.truncf %15 : vector<8x128xf32> to vector<8x128xbf16>
    %c0_12 = arith.constant 0 : index
    %c0_13 = arith.constant 0 : index
    %17 = vector.load %arg6[%c0_12, %c0_13] : memref<128x128xbf16, #tpu.memory_space<vmem>>, vector<128x128xbf16>
    %cst_14 = arith.constant dense<0.000000e+00> : vector<8x128xf32>
    %18 = tpu.matmul %16, %17, %cst_14 {dimension_numbers = #tpu.dot_dimension_numbers<[1], [0], [0], [1], [0, 0, 1, 1], [], []>} : vector<8x128xbf16>, vector<128x128xbf16>, vector<8x128xf32> -> vector<8x128xf32>
    %c0_15 = arith.constant 0 : index
    %c0_16 = arith.constant 0 : index
    %19 = vector.load %arg7[%c0_15, %c0_16] : memref<1x128xf32, #tpu.memory_space<vmem>>, vector<1x128xf32>
    %20 = vector.broadcast %19 : vector<1x128xf32> to vector<8x128xf32>
    %21 = arith.addf %18, %20 : vector<8x128xf32>
    %cst_17 = arith.constant dense<0xFF800000> : vector<8xf32>
    %22 = vector.multi_reduction <maximumf>, %21, %cst_17 [1] : vector<8x128xf32> to vector<8xf32>
    %23 = vector.shape_cast %22 : vector<8xf32> to vector<8x1xf32>
    %24 = vector.broadcast %23 : vector<8x1xf32> to vector<8x128xf32>
    %25 = arith.subf %21, %24 : vector<8x128xf32>
    %26 = math.exp %25 : vector<8x128xf32>
    %cst_18 = arith.constant dense<0.000000e+00> : vector<8xf32>
    %27 = vector.multi_reduction <add>, %26, %cst_18 [1] : vector<8x128xf32> to vector<8xf32>
    %28 = vector.shape_cast %27 : vector<8xf32> to vector<8x1xf32>
    %29 = tpu.reciprocal %28 : vector<8x1xf32> -> vector<8x1xf32>
    %30 = vector.broadcast %29 : vector<8x1xf32> to vector<8x128xf32>
    %31 = arith.mulf %26, %30 : vector<8x128xf32>
    %c0_19 = arith.constant 0 : index
    %c0_20 = arith.constant 0 : index
    %32 = vector.load %arg8[%c0_19, %c0_20] : memref<8x128xf32, #tpu.memory_space<vmem>>, vector<8x128xf32>
    tpu.vector_store %arg8[%c0_19, %c0_20], %31 {strides = array<i32>} : memref<8x128xf32, #tpu.memory_space<vmem>>, vector<8x128xf32>,
    return
  }
  func.func @transform_0(%arg0: i32) -> (i32, i32) {
    %c0_i32 = arith.constant 0 : i32
    %c0_i32_0 = arith.constant 0 : i32
    return %arg0, %c0_i32 : i32, i32
  }
  func.func @transform_1(%arg0: i32) -> (i32, i32) {
    %c0_i32 = arith.constant 0 : i32
    %c0_i32_0 = arith.constant 0 : i32
    %c0_i32_1 = arith.constant 0 : i32
    return %c0_i32, %c0_i32_0 : i32, i32
  }
  func.func @transform_2(%arg0: i32) -> (i32, i32) {
    %c0_i32 = arith.constant 0 : i32
    %c0_i32_0 = arith.constant 0 : i32
    %c0_i32_1 = arith.constant 0 : i32
    return %c0_i32, %c0_i32_0 : i32, i32
  }
  func.func @transform_3(%arg0: i32) -> (i32, i32) {
    %c0_i32 = arith.constant 0 : i32
    %c0_i32_0 = arith.constant 0 : i32
    %c0_i32_1 = arith.constant 0 : i32
    return %c0_i32, %c0_i32_0 : i32, i32
  }
  func.func @transform_4(%arg0: i32) -> (i32, i32) {
    %c0_i32 = arith.constant 0 : i32
    %c0_i32_0 = arith.constant 0 : i32
    %c0_i32_1 = arith.constant 0 : i32
    return %c0_i32, %c0_i32_0 : i32, i32
  }
  func.func @transform_5(%arg0: i32) -> (i32, i32) {
    %c0_i32 = arith.constant 0 : i32
    %c0_i32_0 = arith.constant 0 : i32
    %c0_i32_1 = arith.constant 0 : i32
    return %c0_i32, %c0_i32_0 : i32, i32
  }
  func.func @transform_6(%arg0: i32) -> (i32, i32) {
    %c0_i32 = arith.constant 0 : i32
    %c0_i32_0 = arith.constant 0 : i32
    %c0_i32_1 = arith.constant 0 : i32
    return %c0_i32, %c0_i32_0 : i32, i32
  }
  func.func @transform_7(%arg0: i32) -> (i32, i32) {
    %c0_i32 = arith.constant 0 : i32
    %c0_i32_0 = arith.constant 0 : i32
    return %arg0, %c0_i32 : i32, i32
  }
}

</mosaic_0001>

<bundles_post_ra>
// kernel: tpu_custom_call.1
= control target key start
LH: loop header
LB: loop body
LE: loop exit
PB: predicated region body
PF: predicated region fallthrough
CT: control target
= control target key end

     0   :  { %12 = vsyncpa [#allocation3], 0  ;;  %s671_s0 = inlined_call_operand.vmem [shape: bf16[8,4], index: 0, kind: input, shape index: {}]   ;;  %s672_s1 = inlined_call_operand.vmem [shape: bf16[4,128], index: 1, kind: input, shape index: {}]   ;;  %s673_s2 = inlined_call_operand.vmem [shape: f32[1,128], index: 2, kind: input, shape index: {}]   ;;  %s674_s3 = inlined_call_operand.hbm [shape: bf16[128,128], index: 3, kind: input, shape index: {}]   ;;  %s675_s4 = inlined_call_operand.vmem [shape: f32[1,128], index: 4, kind: input, shape index: {}]   ;;  %s676_s5 = inlined_call_operand.hbm [shape: bf16[128,128], index: 5, kind: input, shape index: {}]   ;;  %s677_s6 = inlined_call_operand.vmem [shape: f32[1,128], index: 6, kind: input, shape index: {}]   ;;  %s678_s7 = inlined_call_operand.hbm [shape: f32[8,128], index: 7, kind: output, shape index: {}]  }
   0x1   :  { %13 = vsyncpa [#allocation6], 0 }
   0x2   :  { %14 = vsyncpa [#allocation4], 0  ;;  %s550_s24 = smov [#allocation2]   ;;  %s478_s28 = scalar_lea.hbm %s674_s3, 1024 }
   0x3   :  { %s26_s25 = sshll.u32 %s550_s24, 4  ;;  %p479_p0 = scmp.ne.s32.totalorder %s674_s3, %s478_s28  ;;  %s27_s25 = int_to_ptr.vmem [resolvable:$true] %s26_s25 }
   0x4   :  { %p482_p1 = scmp.lt.u32.totalorder %s478_s28, %s674_s3 }
   0x6   :  { %p484_p2 = pnand %p482_p1, %p479_p0 }
   0x8   :  { %487 = shalt.err (!%p484_p2)
}
   0x9   :  { %s488_s10 = scalar_lea.vmem %s27_s25, 1024  ;;  %p493_p4 = scmp.lt.s32.totalorder %s27_s25, %s27_s25 }
   0xa   :  { %p489_p3 = scmp.ne.s32.totalorder %s27_s25, %s488_s10  ;;  %p494_p5 = scmp.lt.s32.totalorder %s488_s10, %s488_s10 }
   0xc   :  { %p495_p6 = por %p494_p5, %p493_p4 }
   0xe   :  { %p496_p7 = pnand %p495_p6, %p489_p3 }
  0x10   :  { %499 = shalt.err (!%p496_p7)
}
  0x11   :  { %s551_s11 = smov 64   ;;  %s552_s12 = smov 4  }
  0x12   :  { %32 = dma.hbm_to_vmem [thread:$0]  %s674_s3, 1024, %s27_s25, [#allocation3], %s551_s11, %s551_s11, %s552_s12  }
  0x13   :  { %s553_s15 = smov [#allocation5]   ;;  %s500_s19 = scalar_lea.hbm %s676_s5, 1024 }
  0x14   :  { %s40_s16 = sshll.u32 %s553_s15, 4  ;;  %p501_p8 = scmp.ne.s32.totalorder %s676_s5, %s500_s19  ;;  %s41_s16 = int_to_ptr.vmem [resolvable:$true] %s40_s16 }
  0x15   :  { %p504_p9 = scmp.lt.u32.totalorder %s500_s19, %s676_s5 }
  0x17   :  { %p506_p10 = pnand %p504_p9, %p501_p8 }
  0x19   :  { %509 = shalt.err (!%p506_p10)
}
  0x1a   :  { %s510_s24 = scalar_lea.vmem %s41_s16, 1024  ;;  %p515_p12 = scmp.lt.s32.totalorder %s41_s16, %s41_s16 }
  0x1b   :  { %p511_p11 = scmp.ne.s32.totalorder %s41_s16, %s510_s24  ;;  %p516_p13 = scmp.lt.s32.totalorder %s510_s24, %s510_s24 }
  0x1d   :  { %p517_p0 = por %p516_p13, %p515_p12 }
  0x1f   :  { %p518_p1 = pnand %p517_p0, %p511_p11 }
  0x21   :  { %521 = shalt.err (!%p518_p1)
}
  0x22   :  { %46 = dma.hbm_to_vmem [thread:$0]  %s676_s5, 1024, %s41_s16, [#allocation6], %s551_s11, %s551_s11, %s552_s12  }
  0x23   :  { %544 = dma.done.wait [#allocation3], 1024  }
  0x24   :  { %545 = vsyncadd [#allocation3], 4294966272 }
  0x25   :  { %546 = dma.done.wait [#allocation6], 1024  }
  0x26   :  { %547 = vsyncadd [#allocation6], 4294966272  ;;  %v554_v0 = vmov 0.0   ;;  %vm555_vm0 = vmmov 0   ;;  %vm69_vm1 = vcmask 1041408   ;;  %vm65_vm2 = vcmask 31744  }
  0x27   :  { %405 = vmatprep.subr.bf16.mxu0 %v554_v0  ;;  %407 = vmatprep.mubr.msk.bf16.mxu0 %vm555_vm0, %v554_v0  ;;  %v57_v1 = vld [vmem:[%s672_s1] sm:$0x3]  ;;  %v459_v5 = vld [vmem:[#allocation2 + $0x8] sm:$0xff]   ;;  %v460_v6 = vld [vmem:[#allocation2 + $0x10] sm:$0xff]  }
  0x28   :  { %411 = vmatprep.subr.bf16.mxu1 %v554_v0  ;;  %427 = vmatprep.mubr.msk.bf16.mxu1 %vm555_vm0, %v554_v0  ;;  %v71_v2 = vsel %vm69_vm1, %v57_v1, 0  ;;  %v458_v3 = vld [vmem:[#allocation2] sm:$0xff]   ;;  %v461_v7 = vld [vmem:[#allocation2 + $0x18] sm:$0xff]   ;;  %v463_v9 = vld [vmem:[#allocation2 + $0x28] sm:$0xff]  }
  0x29   :  { %406 = vmatpush3.bf16.msra.mxu0 %v71_v2  ;;  %v56_v4 = vld [vmem:[%s671_s0] sm:$0xf]  ;;  %412 = vmatpush3.bf16.msra.mxu1 %v458_v3  ;;  %v464_v10 = vld [vmem:[#allocation2 + $0x30] sm:$0xff]   ;;  %v465_v11 = vld [vmem:[#allocation2 + $0x38] sm:$0xff]  }
  0x2a   :  { %431 = vmatprep.subr.bf16.mxu0 %v554_v0  ;;  %413 = vmatprep.subr.bf16.mxu1 %v554_v0  ;;  %v462_v8 = vld [vmem:[#allocation2 + $0x20] sm:$0xff]   ;;  %v467_v13 = vld [vmem:[#allocation5 + $0x8] sm:$0xff]   ;;  %v468_v14 = vld [vmem:[#allocation5 + $0x10] sm:$0xff]  }
  0x2b   :  { %v466_v12 = vld [vmem:[#allocation5] sm:$0xff]   ;;  %v469_v15 = vld [vmem:[#allocation5 + $0x18] sm:$0xff]   ;;  %v471_v17 = vld [vmem:[#allocation5 + $0x28] sm:$0xff]  }
  0x2c   :  { %408 = vmatmul.mubr.msk.bf16.vlgmr.msra.gmra.mrb[0].mxu0 %vm65_vm2, %v56_v4  ;;  %v470_v16 = vld [vmem:[#allocation5 + $0x20] sm:$0xff]   ;;  %v472_v26 = vld [vmem:[#allocation5 + $0x30] sm:$0xff]   ;;  %v473_v27 = vld [vmem:[#allocation5 + $0x38] sm:$0xff]  }
  0x2d   :  { %447 = vmatprep.mubr.msk.bf16.mxu0 %vm555_vm0, %v554_v0  ;;  %414 = vmatpush3.bf16.msra.mxu1 %v459_v5  ;;  %v365_v18 = vld [vmem:[%s673_s2] ss:$0 sm:$0xff] }
  0x2e   :  { %415 = vmatprep.subr.bf16.mxu1 %v554_v0  ;;  %432 = vmatpush3.bf16.msra.mxu0 %v466_v12  ;;  %v367_v28 = vld [vmem:[%s675_s4] ss:$0 sm:$0xff]  ;;  %s556_s4 = smov [#allocation7]  }
  0x2f   :  { %433 = vmatprep.subr.bf16.mxu0 %v554_v0  ;;  %v376_v36 = vld [vmem:[%s677_s6] ss:$0 sm:$0xff]  ;;  %s355_s9 = sshll.u32 %s556_s4, 4  ;;  %s356_s9 = int_to_ptr.vmem [resolvable:$true] %s355_s9 }
  0x30   :  { %s522_s6 = scalar_lea.vmem %s356_s9, 128  ;;  %p527_p3 = scmp.lt.s32.totalorder %s356_s9, %s356_s9 }
  0x31   :  { %416 = vmatpush3.bf16.msra.mxu1 %v460_v6  ;;  %p523_p2 = scmp.ne.s32.totalorder %s356_s9, %s522_s6  ;;  %p528_p4 = scmp.lt.s32.totalorder %s522_s6, %s522_s6 }
  0x32   :  { %417 = vmatprep.subr.bf16.mxu1 %v554_v0  ;;  %434 = vmatpush3.bf16.msra.mxu0 %v467_v13 }
  0x33   :  { %435 = vmatprep.subr.bf16.mxu0 %v554_v0  ;;  %p529_p5 = por %p528_p4, %p527_p3 }
  0x35   :  { %418 = vmatpush3.bf16.msra.mxu1 %v461_v7  ;;  %p530_p6 = pnand %p529_p5, %p523_p2 }
  0x36   :  { %419 = vmatprep.subr.bf16.mxu1 %v554_v0  ;;  %436 = vmatpush3.bf16.msra.mxu0 %v468_v14 }
  0x37   :  { %437 = vmatprep.subr.bf16.mxu0 %v554_v0 }
  0x39   :  { %420 = vmatpush3.bf16.msra.mxu1 %v462_v8 }
  0x3a   :  { %421 = vmatprep.subr.bf16.mxu1 %v554_v0  ;;  %438 = vmatpush3.bf16.msra.mxu0 %v469_v15 }
  0x3b   :  { %439 = vmatprep.subr.bf16.mxu0 %v554_v0 }
  0x3d   :  { %422 = vmatpush3.bf16.msra.mxu1 %v463_v9 }
  0x3e   :  { %423 = vmatprep.subr.bf16.mxu1 %v554_v0  ;;  %440 = vmatpush3.bf16.msra.mxu0 %v470_v16 }
  0x3f   :  { %441 = vmatprep.subr.bf16.mxu0 %v554_v0 }
  0x41   :  { %424 = vmatpush3.bf16.msra.mxu1 %v464_v10 }
  0x42   :  { %425 = vmatprep.subr.bf16.mxu1 %v554_v0  ;;  %442 = vmatpush3.bf16.msra.mxu0 %v471_v17 }
  0x43   :  { %443 = vmatprep.subr.bf16.mxu0 %v554_v0 }
  0x45   :  { %426 = vmatpush3.bf16.msra.mxu1 %v465_v11 }
  0x46   :  { %444 = vmatpush3.bf16.msra.mxu0 %v472_v26 }
  0x47   :  { %445 = vmatprep.subr.bf16.mxu0 %v554_v0 }
  0x4a   :  { %446 = vmatpush3.bf16.msra.mxu0 %v473_v27 }
  0xff   :  { %v107_v19 = vpop.f32.mrb[0].mxu0 }
 0x100   :  { %v108_v20 = vadd.f32 %v365_v18, %v107_v19  ;;  %v409_v21 = vpop.f32.mrb[1].mxu0 }
 0x101   :  { %v110_v22 = vpop.f32.mrb[2].mxu0 }
 0x102   :  { %v113_v23 = vmax.f32 %v108_v20, 0.0  ;;  %v410_v24 = vpop.f32.mrb[3].mxu0 }
 0x104   :  { %v114_v25 = vpack.c.bf16 %v113_v23, %v113_v23 }
 0x106   :  { %428 = vmatmul.mubr.bf16.vlgmr.msra.gmra.mrb[0].mxu1 %v114_v25 }
 0x1d9   :  { %v220_v29 = vpop.f32.mrb[0].mxu1 }
 0x1da   :  { %v221_v30 = vadd.f32 %v367_v28, %v220_v29  ;;  %v429_v31 = vpop.f32.mrb[1].mxu1 }
 0x1db   :  { %v223_v32 = vpop.f32.mrb[2].mxu1 }
 0x1dc   :  { %v226_v33 = vmax.f32 %v221_v30, 0.0  ;;  %v430_v34 = vpop.f32.mrb[3].mxu1 }
 0x1de   :  { %v227_v35 = vpack.c.bf16 %v226_v33, %v226_v33 }
 0x1e0   :  { %448 = vmatmul.mubr.bf16.vlgmr.msra.gmra.mrb[4].mxu0 %v227_v35 }
 0x2b3   :  { %v333_v37 = vpop.f32.mrb[4].mxu0 }
 0x2b4   :  { %v334_v38 = vadd.f32 %v376_v36, %v333_v37  ;;  %v449_v39 = vpop.f32.mrb[5].mxu0 }
 0x2b5   :  { %v336_v40 = vpop.f32.mrb[6].mxu0 }
 0x2b6   :  { %339 = vmax.xlane.f32.xlu0 %v334_v38  ;;  %v450_v41 = vpop.f32.mrb[7].mxu0 }
 0x343   :  { %v340_v42 = vpop.xlane.xlu0 %339 }
 0x344   :  { %v341_v43 = vsub.f32 %v334_v38, %v340_v42 }
 0x346   :  { %v342_v44 = vmul.f32 1.442695, %v341_v43 }
 0x348   :  { %474 = vpow2.f32 %v342_v44 }
 0x352   :  { %v475_v45 = vpop.eup %474 }
 0x353   :  { %344 = vadd.xlane.f32.xlu0 %v475_v45 }
 0x3e0   :  { %v345_v46 = vpop.xlane.xlu0 %344 }
 0x3e1   :  { %476 = vrcp.f32 %v345_v46 }
 0x3eb   :  { %v477_v47 = vpop.eup %476 }
 0x3ec   :  { %v347_v48 = vmul.f32 %v477_v47, %v475_v45 }
 0x3ee   :  { %348 = vst [vmem:[#allocation7] sm:$0xff] %v347_v48 }
 0x3ef   :  { %533 = shalt.err (!%p530_p6)
}
 0x3f0   :  { %s534_s12 = scalar_lea.hbm %s678_s7, 128 }
 0x3f1   :  { %p535_p7 = scmp.ne.s32.totalorder %s678_s7, %s534_s12  ;;  %p538_p8 = scmp.lt.u32.totalorder %s534_s12, %s678_s7 }
 0x3f3   :  { %p540_p9 = pnand %p538_p8, %p535_p7 }
 0x3f5   :  { %543 = shalt.err (!%p540_p9)
}
 0x3f6   :  { %358 = dma.vmem_to_hbm [thread:$0]  %s356_s9, 128, %s678_s7, [#allocation4]  }
 0x3f7   :  { %548 = dma.done.wait [#allocation4], 128  }
 0x3f8   :  { %549 = vsyncadd [#allocation4], 4294967168 }
 0x3f9   :  { %362 = vsyncpa [#allocation3], 1 }
 0x3fa   :  { %363 = vsyncpa [#allocation6], 1 }
 0x3fb   :  { %364 = vsyncpa [#allocation4], 1 }

</bundles_post_ra>
